<compile_context>
chip_gen: v6e
topology: v6e:2x2x1
jax: 0.10.0
libtpu: 0.0.40
codegen_flags: <defaults>
</compile_context>

<pallas_src>
import functools

import jax
import jax.numpy as jnp
from jax.experimental import pallas as pl
from jax.experimental.pallas import tpu as pltpu


def _focal_loss_kernel(x_ref, tw_ref, out_ref, *, gamma, sqrt_path, tb,
                       steps_inner, total_rows, acc_rows, needs_mask):
    o = pl.program_id(0)
    s = pl.program_id(1)

    # Per-outer-chunk vector accumulator lives in the resident output block.
    @pl.when(s == 0)
    def _():
        out_ref[...] = jnp.zeros_like(out_ref)

    x = x_ref[...].astype(jnp.float32)          # (tb, C)
    wt = tw_ref[0:1, :]                         # (1, C)  == w * t_smoothed
    w1t = tw_ref[1:2, :]                        # (1, C)  == w * (1 - t_smoothed)

    x_pos = jnp.maximum(x, 0.0)                 # inputs.clamp(min=0)
    x_neg = jnp.minimum(x, 0.0)                 # inputs.clamp(max=0)
    ax = x_pos - x_neg                          # |x|

    e = jnp.exp(-ax)                            # exp(-|x|)            (EUP)
    logterm = jnp.log(1.0 + e)                  # log(1 + exp(-|x|))   (EUP)

    if sqrt_path:                               # gamma == 0.5 specialization
        q = jnp.sqrt(e)                         # exp(-gamma*|x|)
        p = jax.lax.rsqrt(1.0 + e)              # exp(-gamma*logterm)
    else:
        q = jnp.exp(-gamma * ax)
        p = jnp.exp(-gamma * logterm)

    pq = p * q                                  # single shared vmul
    neg = x < 0.0
    sig_pos = jnp.where(neg, pq, p)             # exp(gamma*x_neg  - gamma*logterm)
    sig_neg = jnp.where(neg, p, pq)             # exp(-gamma*x_pos - gamma*logterm)

    # w * loss == sig_pos*(x_pos+L)*w*(1-t) + sig_neg*(L-x_neg)*w*t
    wloss = sig_pos * (x_pos + logterm) * w1t + sig_neg * (logterm - x_neg) * wt

    def reduce_to_acc(v):
        if tb == acc_rows:
            return v
        # pure vreg adds over sublane groups; no cross-lane/sublane XLU reduce
        return jnp.sum(v.reshape(tb // acc_rows, acc_rows, v.shape[-1]), axis=0)

    if needs_mask:
        row0 = (o * steps_inner + s) * tb       # logical (unclamped) row origin
        is_full = row0 + tb <= total_rows

        @pl.when(is_full)                       # hot path: no mask cost
        def _():
            out_ref[...] += reduce_to_acc(wloss)[None]

        @pl.when(jnp.logical_not(is_full))      # partial / overshoot tile only
        def _():
            rows = row0 + jax.lax.broadcasted_iota(jnp.int32, wloss.shape, 0)
            masked = jnp.where(rows < total_rows, wloss, 0.0)
            out_ref[...] += reduce_to_acc(masked)[None]
    else:
        out_ref[...] += reduce_to_acc(wloss)[None]


def focal_loss(inputs, targets, w, *, epsilon=0.1, gamma=0.5, label_smooth=True,
               max_rows_per_tile=None):
    """inputs: (B, K) logits, targets: (K,), w: (K,) class weights -> scalar."""
    B, K = inputs.shape
    eps = float(epsilon) if label_smooth else 0.0
    gamma = float(gamma)

    # Fold label smoothing and class weights once (per-class constants).
    t = jnp.asarray(targets, jnp.float32)
    wv = jnp.asarray(w, jnp.float32)
    t_s = (1.0 - eps) * t + eps / K
    wt = wv * t_s
    w1t = wv * (1.0 - t_s)

    x = inputs  # native dtype; cast to f32 inside the kernel

    if K <= 128 and 128 % K == 0 and (B * K) % 128 == 0:
        # Lane-packing path: free contiguous reshape, lane-periodic weights.
        C = 128
        R = (B * K) // 128
        x2d = x.reshape(R, C)
        rep = 128 // K
        tw = jnp.stack([jnp.tile(wt, rep), jnp.tile(w1t, rep)], axis=0)   # (2,128)
    else:
        # Fallback: last block dim equals the full array dim -> no K pad copy.
        C = K
        R = B
        x2d = x
        tw = jnp.stack([wt, w1t], axis=0)                                 # (2, K)

    # Generation-aware tile sizing.
    try:
        vmem_cap = int(pltpu.get_tpu_info().vmem_capacity_bytes)
    except Exception:
        vmem_cap = 64 << 20
    per_buf = (8 << 20) if vmem_cap >= (96 << 20) else (6 << 20)
    itemsize = jnp.dtype(x2d.dtype).itemsize
    row_bytes = C * itemsize
    cap_rows = max(8, per_buf // row_bytes)
    if max_rows_per_tile is not None:
        cap_rows = min(cap_rows, int(max_rows_per_tile))

    if R <= 8:
        tb = R
        acc_rows = R
    else:
        tb = max(8, min((cap_rows // 8) * 8, (R // 8) * 8))
        acc_rows = 8

    total_tiles = pl.cdiv(R, tb)
    n_outer = 2 if total_tiles >= 2 else 1       # shard across v7x TensorCores
    steps_inner = pl.cdiv(total_tiles, n_outer)
    needs_mask = (n_outer * steps_inner * tb) != R

    kernel = functools.partial(
        _focal_loss_kernel, gamma=gamma, sqrt_path=(gamma == 0.5), tb=tb,
        steps_inner=steps_inner, total_rows=R, acc_rows=acc_rows,
        needs_mask=needs_mask)

    def x_index_map(o, s):
        # Clamp so an overshoot tile's DMA stays in bounds; the in-kernel mask
        # (keyed on the *logical* tile index) zeroes its contribution.
        return (jnp.minimum(o * steps_inner + s, total_tiles - 1), 0)

    out = pl.pallas_call(
        kernel,
        out_shape=jax.ShapeDtypeStruct((n_outer, acc_rows, C), jnp.float32),
        grid=(n_outer, steps_inner),
        in_specs=[
            pl.BlockSpec((tb, C), x_index_map),          # pipelined batch tile
            pl.BlockSpec((2, C), lambda o, s: (0, 0)),   # folded per-class consts
        ],
        out_specs=pl.BlockSpec((1, acc_rows, C), lambda o, s: (o, 0, 0)),
        compiler_params=pltpu.CompilerParams(
            dimension_semantics=("parallel", "arbitrary"),
            vmem_limit_bytes=int(min(vmem_cap // 2, 64 << 20))),
        cost_estimate=pl.CostEstimate(
            flops=12 * B * K,
            transcendentals=4 * B * K,
            bytes_accessed=B * K * itemsize + 2 * C * 4 + n_outer * acc_rows * C * 4),
    )(x2d, tw)

    # Tiny final reduce + batch mean in the wrapper (partials stay f32).
    return out.sum() * (1.0 / B)


def _focal_loss_ref(inputs, targets, w, *, epsilon=0.1, gamma=0.5, label_smooth=True):
    """Pure-JAX mirror of the PyTorch forward, for correctness checking."""
    K = inputs.shape[1]
    eps = epsilon if label_smooth else 0.0
    t = (1.0 - eps) * targets + eps / K
    x = inputs.astype(jnp.float32)
    x_pos = jnp.maximum(x, 0.0)
    x_neg = jnp.minimum(x, 0.0)
    L = jnp.log(1.0 + jnp.exp(-jnp.abs(x)))
    sig_pos = jnp.exp(gamma * x_neg - gamma * L)
    sig_neg = jnp.exp(-gamma * x_pos - gamma * L)
    first_pos = -sig_pos * x_pos * (1.0 - t)
    first_neg = sig_neg * x_neg * t
    loss = -(first_pos + first_neg - sig_neg * L * t - sig_pos * L * (1.0 - t))
    return (w * loss.mean(0)).sum()


if __name__ == "__main__":
    key = jax.random.PRNGKey(0)

    configs = [
        # (batch, num_classes, max_rows_per_tile) -- all small, deterministic.
        (8, 16, None),     # pack path, single tile
        (1000, 16, 48),    # pack path, multi-tile, partial + overshoot tile, 2-D grid
        (6, 10, None),     # fallback path (128 % K != 0), full-dim blocks
    ]

    ok = True
    for idx, (batch, num_classes, mrpt) in enumerate(configs):
        k1, k2 = jax.random.split(jax.random.fold_in(key, idx))
        inputs = jax.random.normal(k1, (batch, num_classes), dtype=jnp.float32) * 2.0
        targets = (jax.random.uniform(k2, (num_classes,)) > 0.5).astype(jnp.float32)
        w = jnp.linspace(0.5, 1.5, num_classes, dtype=jnp.float32)

        out = focal_loss(inputs, targets, w, epsilon=0.1, gamma=0.5,
                         label_smooth=True, max_rows_per_tile=mrpt)
        out = jax.block_until_ready(out)

        ref = _focal_loss_ref(inputs, targets, w, epsilon=0.1, gamma=0.5,
                              label_smooth=True)
        if not jnp.allclose(out, ref, rtol=1e-4, atol=1e-4):
            ok = False
            print("MISMATCH", idx, out, ref)

    assert ok
    print("KERNEL_OK")
</pallas_src>

<mosaic_0001>
module attributes {stable_mosaic.version = 11 : i64} {
  func.func @_focal_loss_kernel(%arg0: i32, %arg1: i32, %arg2: memref<1x128xf32, #tpu.memory_space<vmem>>, %arg3: memref<2x128xf32, #tpu.memory_space<vmem>>, %arg4: memref<1x1x128xf32, #tpu.memory_space<vmem>>) attributes {dimension_semantics = [#tpu.dimension_semantics<parallel>, #tpu.dimension_semantics<arbitrary>], iteration_bounds = array<i64: 1, 1>, scalar_prefetch = 0 : i64, scratch_operands = 0 : i64, tpu.core_type = #tpu.core_type<tc>, window_params = [{transform_indices = @transform_0, window_bounds = array<i64: 1, 128>}, {pipeline_mode = #tpu.pipeline_mode<synchronous>, transform_indices = @transform_1, window_bounds = array<i64: 2, 128>}, {transform_indices = @transform_2, window_bounds = array<i64: 1, 1, 128>}]} {
    %c0_i32 = arith.constant 0 : i32
    %0 = arith.cmpi eq, %arg1, %c0_i32 : i32
    %1 = arith.extui %0 : i1 to i32
    %c0_i32_0 = arith.constant 0 : i32
    %2 = arith.cmpi ne, %1, %c0_i32_0 : i32
    scf.if %2 {
      %cst_16 = arith.constant 0.000000e+00 : f32
      %37 = vector.broadcast %cst_16 : f32 to vector<1x1x128xf32>
      %c0_17 = arith.constant 0 : index
      %c0_18 = arith.constant 0 : index
      %c0_19 = arith.constant 0 : index
      %38 = vector.load %arg4[%c0_17, %c0_18, %c0_19] : memref<1x1x128xf32, #tpu.memory_space<vmem>>, vector<1x1x128xf32>
      tpu.vector_store %arg4[%c0_17, %c0_18, %c0_19], %37 {strides = array<i32>} : memref<1x1x128xf32, #tpu.memory_space<vmem>>, vector<1x1x128xf32>,
    } else {
    }
    %c0 = arith.constant 0 : index
    %c0_1 = arith.constant 0 : index
    %3 = vector.load %arg2[%c0, %c0_1] : memref<1x128xf32, #tpu.memory_space<vmem>>, vector<1x128xf32>
    %c0_2 = arith.constant 0 : index
    %c0_3 = arith.constant 0 : index
    %4 = vector.load %arg3[%c0_2, %c0_3] : memref<2x128xf32, #tpu.memory_space<vmem>>, vector<1x128xf32>
    %c1 = arith.constant 1 : index
    %c0_4 = arith.constant 0 : index
    %5 = vector.load %arg3[%c1, %c0_4] : memref<2x128xf32, #tpu.memory_space<vmem>>, vector<1x128xf32>
    %cst = arith.constant 0.000000e+00 : f32
    %6 = vector.broadcast %cst : f32 to vector<1x128xf32>
    %7 = arith.maximumf %3, %6 : vector<1x128xf32>
    %cst_5 = arith.constant 0.000000e+00 : f32
    %8 = vector.broadcast %cst_5 : f32 to vector<1x128xf32>
    %9 = arith.minimumf %3, %8 : vector<1x128xf32>
    %10 = arith.subf %7, %9 : vector<1x128xf32>
    %cst_6 = arith.constant 0.000000e+00 : f32
    %11 = vector.broadcast %cst_6 : f32 to vector<1x128xf32>
    %12 = arith.subf %11, %10 : vector<1x128xf32>
    %13 = math.exp %12 : vector<1x128xf32>
    %cst_7 = arith.constant 1.000000e+00 : f32
    %14 = vector.broadcast %cst_7 : f32 to vector<1x128xf32>
    %15 = arith.addf %14, %13 : vector<1x128xf32>
    %16 = math.log %15 : vector<1x128xf32>
    %17 = math.sqrt %13 : vector<1x128xf32>
    %cst_8 = arith.constant 1.000000e+00 : f32
    %18 = vector.broadcast %cst_8 : f32 to vector<1x128xf32>
    %19 = arith.addf %18, %13 : vector<1x128xf32>
    %20 = math.rsqrt %19 : vector<1x128xf32>
    %21 = arith.mulf %20, %17 : vector<1x128xf32>
    %cst_9 = arith.constant 0.000000e+00 : f32
    %22 = vector.broadcast %cst_9 : f32 to vector<1x128xf32>
    %23 = arith.cmpf olt, %3, %22 : vector<1x128xf32>
    %24 = arith.select %23, %21, %20 : vector<1x128xi1>, vector<1x128xf32>
    %25 = arith.select %23, %20, %21 : vector<1x128xi1>, vector<1x128xf32>
    %26 = arith.addf %7, %16 : vector<1x128xf32>
    %27 = arith.mulf %24, %26 : vector<1x128xf32>
    %28 = arith.mulf %27, %5 : vector<1x128xf32>
    %29 = arith.subf %16, %9 : vector<1x128xf32>
    %30 = arith.mulf %25, %29 : vector<1x128xf32>
    %31 = arith.mulf %30, %4 : vector<1x128xf32>
    %32 = arith.addf %28, %31 : vector<1x128xf32>
    %c0_10 = arith.constant 0 : index
    %c0_11 = arith.constant 0 : index
    %c0_12 = arith.constant 0 : index
    %33 = vector.load %arg4[%c0_10, %c0_11, %c0_12] : memref<1x1x128xf32, #tpu.memory_space<vmem>>, vector<1x1x128xf32>
    %34 = vector.shape_cast %32 : vector<1x128xf32> to vector<1x1x128xf32>
    %35 = arith.addf %33, %34 : vector<1x1x128xf32>
    %c0_13 = arith.constant 0 : index
    %c0_14 = arith.constant 0 : index
    %c0_15 = arith.constant 0 : index
    %36 = vector.load %arg4[%c0_13, %c0_14, %c0_15] : memref<1x1x128xf32, #tpu.memory_space<vmem>>, vector<1x1x128xf32>
    tpu.vector_store %arg4[%c0_13, %c0_14, %c0_15], %35 {strides = array<i32>} : memref<1x1x128xf32, #tpu.memory_space<vmem>>, vector<1x1x128xf32>,
    return
  }
  func.func @transform_0(%arg0: i32, %arg1: i32) -> (i32, i32) {
    %c1_i32 = arith.constant 1 : i32
    %0 = arith.muli %arg0, %c1_i32 : i32
    %1 = arith.addi %0, %arg1 : i32
    %c0_i32 = arith.constant 0 : i32
    %2 = arith.minsi %1, %c0_i32 : i32
    %c0_i32_0 = arith.constant 0 : i32
    %c0_i32_1 = arith.constant 0 : i32
    return %2, %c0_i32_0 : i32, i32
  }
  func.func @transform_1(%arg0: i32, %arg1: i32) -> (i32, i32) {
    %c0_i32 = arith.constant 0 : i32
    %c0_i32_0 = arith.constant 0 : i32
    %c0_i32_1 = arith.constant 0 : i32
    return %c0_i32, %c0_i32_0 : i32, i32
  }
  func.func @transform_2(%arg0: i32, %arg1: i32) -> (i32, i32, i32) {
    %c0_i32 = arith.constant 0 : i32
    %c0_i32_0 = arith.constant 0 : i32
    %c0_i32_1 = arith.constant 0 : i32
    return %arg0, %c0_i32, %c0_i32_0 : i32, i32, i32
  }
}

</mosaic_0001>

<bundles_post_ra>
// kernel: tpu_custom_call.1
= control target key start
LH: loop header
LB: loop body
LE: loop exit
PB: predicated region body
PF: predicated region fallthrough
CT: control target
= control target key end

     0   :  { %7 = vsyncpa [#allocation3], 0  ;;  %s207_s0 = inlined_call_operand.hbm [shape: f32[1,128], index: 0, kind: input, shape index: {}]   ;;  %s208_s1 = inlined_call_operand.hbm [shape: f32[2,128], index: 1, kind: input, shape index: {}]   ;;  %s209_s2 = inlined_call_operand.hbm [shape: f32[1,1,128], index: 2, kind: output, shape index: {}]  }
   0x1   :  { %8 = vsyncpa [#allocation6], 0 }
   0x2   :  { %9 = vsyncpa [#allocation4], 0  ;;  %s179_s9 = smov [#allocation2]   ;;  %s180_s11 = smov [#allocation5]  }
   0x3   :  { %s21_s10 = sshll.u32 %s179_s9, 4  ;;  %s31_s12 = sshll.u32 %s180_s11, 4  ;;  %s22_s10 = int_to_ptr.vmem [resolvable:$true] %s21_s10  ;;  %s32_s12 = int_to_ptr.vmem [resolvable:$true] %s31_s12 }
   0x4   :  { %s121_s13 = scalar_lea.vmem %s22_s10, 16  ;;  %s125_s14 = scalar_lea.vmem %s22_s10, 32 }
   0x5   :  { %p122_p0 = scmp.ne.s32.totalorder %s22_s10, %s121_s13  ;;  %p126_p1 = scmp.lt.s32.totalorder %s22_s10, %s22_s10 }
   0x6   :  { %p127_p2 = scmp.lt.s32.totalorder %s125_s14, %s121_s13 }
   0x8   :  { %p128_p3 = por %p127_p2, %p126_p1 }
   0xa   :  { %p129_p4 = pnand %p128_p3, %p122_p0 }
   0xc   :  { %132 = shalt.err (!%p129_p4)
}
   0xd   :  { %24 = dma.hbm_to_vmem [thread:$0]  %s207_s0, 16, %s22_s10, [#allocation3]  }
   0xe   :  { %s141_s17 = scalar_lea.vmem %s32_s12, 32  ;;  %p146_p6 = scmp.lt.s32.totalorder %s32_s12, %s32_s12 }
   0xf   :  { %p142_p5 = scmp.ne.s32.totalorder %s32_s12, %s141_s17  ;;  %p147_p7 = scmp.lt.s32.totalorder %s141_s17, %s141_s17 }
  0x11   :  { %p148_p8 = por %p147_p7, %p146_p6 }
  0x13   :  { %p149_p9 = pnand %p148_p8, %p142_p5 }
  0x15   :  { %152 = shalt.err (!%p149_p9)
}
  0x16   :  { %34 = dma.hbm_to_vmem [thread:$0]  %s208_s1, 32, %s32_s12, [#allocation6]  }
  0x17   :  { %173 = dma.done.wait [#allocation3], 16  }
  0x18   :  { %174 = vsyncadd [#allocation3], 4294967280 }
  0x19   :  { %175 = dma.done.wait [#allocation6], 32  }
  0x1a   :  { %176 = vsyncadd [#allocation6], 4294967264  ;;  %v181_v0 = vmov 0.0   ;;  %v49_v1 = vld [vmem:[#allocation2] sm:$0x1]  ;;  %s182_s0 = smov [#allocation7]  }
  0x1b   :  { %48 = vst [vmem:[#allocation7] sm:$0x1] %v181_v0  ;;  %v52_v2 = vmax.f32 %v49_v1, 0.0  ;;  %v53_v3 = vmin.f32 %v49_v1, 0.0  ;;  %vm70_vm2 = vcmp.lt.f32.partialorder %v49_v1, 0.0  ;;  %s89_s1 = sshll.u32 %s182_s0, 4  ;;  %s90_s1 = int_to_ptr.vmem [resolvable:$true] %s89_s1 }
  0x1c   :  { %v50_v20 = vld [vmem:[#allocation5] sm:$0x1]  ;;  %v51_v21 = vld [vmem:[#allocation5 + $0x1] sm:$0x1]  ;;  %s153_s20 = scalar_lea.vmem %s90_s1, 16  ;;  %s157_s21 = scalar_lea.vmem %s90_s1, 32 }
  0x1d   :  { %v54_v4 = vsub.f32 %v52_v2, %v53_v3  ;;  %p154_p10 = scmp.ne.s32.totalorder %s90_s1, %s153_s20  ;;  %p158_p11 = scmp.lt.s32.totalorder %s90_s1, %s90_s1 }
  0x1e   :  { %p159_p12 = scmp.lt.s32.totalorder %s157_s21, %s153_s20 }
  0x1f   :  { %v55_v5 = vsub.f32 0.0, %v54_v4 }
  0x20   :  { %p160_p13 = por %p159_p12, %p158_p11 }
  0x21   :  { %v56_v6 = vmul.f32 1.442695, %v55_v5 }
  0x22   :  { %v80_v28 = vld [vmem:[#allocation7] sm:$0x1]  ;;  %p161_p0 = pnand %p160_p13, %p154_p10 }
  0x23   :  { %105 = vpow2.f32 %v56_v6 }
  0x30   :  { %v106_v7 = vpop.eup %105 }
  0x31   :  { %v58_v8 = vadd.f32 1.0, %v106_v7  ;;  %107 = vrsqrt.f32 %v106_v7  ;;  %vm63_vm0 = vcmp.eq.f32.partialorder %v106_v7, inf  ;;  %v66_v10 = vand.u32 2147483648, %v106_v7 }
  0x32   :  { %vm65_vm1 = vcmp.eq.f32.partialorder %v106_v7, 0.0 }
  0x33   :  { %109 = vlog2.f32 %v58_v8 }
  0x34   :  { %111 = vrsqrt.f32 %v58_v8 }
  0x3e   :  { %v108_v9 = vpop.eup %107 }
  0x3f   :  { %v62_v11 = vmul.f32 %v108_v9, %v106_v7 }
  0x40   :  { %v110_v12 = vpop.eup %109 }
  0x41   :  { %v112_v13 = vpop.eup %111  ;;  %v60_v14 = vmul.f32 0.6931472, %v110_v12  ;;  %v64_v15 = vsel %vm63_vm0, %v106_v7, %v62_v11 }
  0x42   :  { %v67_v16 = vsel %vm65_vm1, %v66_v10, %v64_v15 }
  0x43   :  { %v69_v17 = vmul.f32 %v112_v13, %v67_v16  ;;  %v73_v18 = vadd.f32 %v60_v14, %v52_v2  ;;  %v76_v19 = vsub.f32 %v60_v14, %v53_v3 }
  0x45   :  { %v71_v22 = vsel %vm70_vm2, %v69_v17, %v112_v13  ;;  %v72_v23 = vsel %vm70_vm2, %v112_v13, %v69_v17 }
  0x46   :  { %v74_v24 = vmul.f32 %v73_v18, %v71_v22  ;;  %v77_v25 = vmul.f32 %v76_v19, %v72_v23 }
  0x48   :  { %v75_v26 = vmul.f32 %v74_v24, %v51_v21  ;;  %v78_v27 = vmul.f32 %v77_v25, %v50_v20 }
  0x4a   :  { %v79_v29 = vadd.f32 %v78_v27, %v75_v26 }
  0x4c   :  { %v81_v30 = vadd.f32 %v80_v28, %v79_v29 }
  0x4e   :  { %82 = vst [vmem:[#allocation7] sm:$0x1] %v81_v30 }
  0x4f   :  { %164 = shalt.err (!%p161_p0)
}
  0x50   :  { %92 = dma.vmem_to_hbm [thread:$0]  %s90_s1, 16, %s209_s2, [#allocation4]  }
  0x51   :  { %177 = dma.done.wait [#allocation4], 16  }
  0x52   :  { %178 = vsyncadd [#allocation4], 4294967280 }
  0x53   :  { %96 = vsyncpa [#allocation3], 1 }
  0x54   :  { %97 = vsyncpa [#allocation6], 1 }
  0x55   :  { %98 = vsyncpa [#allocation4], 1 }

</bundles_post_ra>
